<compile_context>
chip_gen: v6e
topology: v6e:2x2x1
jax: 0.10.0
libtpu: 0.0.40
codegen_flags: <defaults>
</compile_context>

<pallas_src>
import functools

import jax
import jax.numpy as jnp
from jax.experimental import pallas as pl
from jax.experimental.pallas import tpu as pltpu


def _round_up(v, m):
    return ((v + m - 1) // m) * m


def _fused_mlp_kernel(*refs, n_layers):
    """refs = (x_ref, w0_ref, b0_ref, w1_ref, b1_ref, ..., o_ref).

    Computes h = ReLU(... ReLU(ReLU(x @ W0 + b0) @ W1 + b1) ...) entirely
    in-kernel; the hidden activation never touches HBM.
    """
    x_ref = refs[0]
    o_ref = refs[-1]
    h = x_ref[...]
    for l in range(n_layers):  # static Python unroll: layer count is compile-time
        w_ref = refs[1 + 2 * l]
        b_ref = refs[2 + 2 * l]
        h = jnp.dot(h, w_ref[...], preferred_element_type=jnp.float32)
        h = h + b_ref[...]        # (1, P) bias broadcasts over the row tile
        h = jnp.maximum(h, 0.0)   # every Linear in the module is followed by ReLU
    o_ref[...] = h.astype(o_ref.dtype)


def mlp_forward(x, params):
    """x: (N, K0) float32; params: list of (w, b) with w: (in, out), b: (out,).

    Returns (N, out_last) = Sequential(Linear, ReLU, ...)(x) in one fused
    Pallas kernel call.
    """
    N, K0 = x.shape
    n_layers = len(params)
    dims = [K0] + [w.shape[1] for (w, _) in params]
    # Pad every feature dim to a multiple of 128 -> lane-dense tiles everywhere.
    pdims = [_round_up(d, 128) for d in dims]

    # Batch tiling: tm rows per grid step, multiple of 8 (sublane), capped at 256.
    tm = min(_round_up(max(N, 1), 8), 256)
    Np = _round_up(N, tm)

    # Zero-pad the input and parameters (exact for Linear+ReLU, see header).
    xp = jnp.zeros((Np, pdims[0]), x.dtype).at[:N, :K0].set(x)
    padded_ops = []
    for l, (w, b) in enumerate(params):
        kin, kout = w.shape
        wp = jnp.zeros((pdims[l], pdims[l + 1]), w.dtype).at[:kin, :kout].set(w)
        bp = jnp.zeros((1, pdims[l + 1]), b.dtype).at[0, :kout].set(b)
        padded_ops += [wp, bp]

    grid = (Np // tm,)
    in_specs = [pl.BlockSpec((tm, pdims[0]), lambda i: (i, 0))]
    for l in range(n_layers):
        # Weights/biases: full blocks, constant index_map -> resident in VMEM
        # across all batch-grid steps (fetched once, reused every iteration).
        in_specs.append(
            pl.BlockSpec((pdims[l], pdims[l + 1]), lambda i: (0, 0)))
        in_specs.append(
            pl.BlockSpec((1, pdims[l + 1]), lambda i: (0, 0)))
    out_specs = pl.BlockSpec((tm, pdims[-1]), lambda i: (i, 0))

    out_padded = pl.pallas_call(
        functools.partial(_fused_mlp_kernel, n_layers=n_layers),
        out_shape=jax.ShapeDtypeStruct((Np, pdims[-1]), x.dtype),
        grid=grid,
        in_specs=in_specs,
        out_specs=out_specs,
        compiler_params=pltpu.CompilerParams(
            # Batch tiles are independent -> shard across TensorCores on v7x.
            dimension_semantics=("parallel",),
            # Explicit budget that still fits v7x's 64 MiB physical VMEM.
            vmem_limit_bytes=64 * 1024 * 1024,
        ),
    )(xp, *padded_ops)

    return out_padded[:N, :dims[-1]]


def init_mlp_params(layer_sizes, seed=0):
    """Deterministic init mirroring weights_init: bias = 0,
    weight ~ xavier_uniform_(gain=0.5). Weights stored as (in, out) so the
    kernel computes y = x @ W + b directly on the MXU."""
    key = jax.random.PRNGKey(seed)
    params = []
    gain = 0.5
    for i in range(len(layer_sizes) - 1):
        fan_in, fan_out = layer_sizes[i], layer_sizes[i + 1]
        key, sub = jax.random.split(key)
        bound = gain * (6.0 / (fan_in + fan_out)) ** 0.5
        w = jax.random.uniform(sub, (fan_in, fan_out), jnp.float32,
                               minval=-bound, maxval=bound)
        b = jnp.zeros((fan_out,), jnp.float32)
        params.append((w, b))
    return params


def mlp_reference(x, params):
    h = x
    for w, b in params:
        h = jnp.maximum(h @ w + b, 0.0)
    return h


if __name__ == "__main__":
    layer_sizes = [32, 64, 16]   # small, consistent with MLP(layer_sizes)
    batch = 8

    params = init_mlp_params(layer_sizes, seed=0)
    key = jax.random.PRNGKey(0)
    x = jax.random.normal(key, (batch, layer_sizes[0]), jnp.float32)

    out = mlp_forward(x, params)
    out = jax.block_until_ready(out)

    ref = mlp_reference(x, params)
    assert out.shape == (batch, layer_sizes[-1])
    assert jnp.allclose(out, ref, atol=1e-4, rtol=1e-5), (
        float(jnp.max(jnp.abs(out - ref))))

    print("KERNEL_OK")
</pallas_src>

<mosaic_0001>
module attributes {stable_mosaic.version = 11 : i64} {
  func.func @_fused_mlp_kernel(%arg0: i32, %arg1: memref<8x128xf32, #tpu.memory_space<vmem>>, %arg2: memref<128x128xf32, #tpu.memory_space<vmem>>, %arg3: memref<1x128xf32, #tpu.memory_space<vmem>>, %arg4: memref<128x128xf32, #tpu.memory_space<vmem>>, %arg5: memref<1x128xf32, #tpu.memory_space<vmem>>, %arg6: memref<8x128xf32, #tpu.memory_space<vmem>>) attributes {dimension_semantics = [#tpu.dimension_semantics<parallel>], iteration_bounds = array<i64: 1>, scalar_prefetch = 0 : i64, scratch_operands = 0 : i64, tpu.core_type = #tpu.core_type<tc>, window_params = [{transform_indices = @transform_0, window_bounds = array<i64: 8, 128>}, {pipeline_mode = #tpu.pipeline_mode<synchronous>, transform_indices = @transform_1, window_bounds = array<i64: 128, 128>}, {pipeline_mode = #tpu.pipeline_mode<synchronous>, transform_indices = @transform_2, window_bounds = array<i64: 1, 128>}, {pipeline_mode = #tpu.pipeline_mode<synchronous>, transform_indices = @transform_3, window_bounds = array<i64: 128, 128>}, {pipeline_mode = #tpu.pipeline_mode<synchronous>, transform_indices = @transform_4, window_bounds = array<i64: 1, 128>}, {transform_indices = @transform_5, window_bounds = array<i64: 8, 128>}]} {
    %c0 = arith.constant 0 : index
    %c0_0 = arith.constant 0 : index
    %0 = vector.load %arg1[%c0, %c0_0] : memref<8x128xf32, #tpu.memory_space<vmem>>, vector<8x128xf32>
    %c0_1 = arith.constant 0 : index
    %c0_2 = arith.constant 0 : index
    %1 = vector.load %arg2[%c0_1, %c0_2] : memref<128x128xf32, #tpu.memory_space<vmem>>, vector<128x128xf32>
    %cst = arith.constant dense<0.000000e+00> : vector<8x128xf32>
    %2 = tpu.matmul %0, %1, %cst {dimension_numbers = #tpu.dot_dimension_numbers<[1], [0], [0], [1], [0, 0, 1, 1], [], []>} : vector<8x128xf32>, vector<128x128xf32>, vector<8x128xf32> -> vector<8x128xf32>
    %c0_3 = arith.constant 0 : index
    %c0_4 = arith.constant 0 : index
    %3 = vector.load %arg3[%c0_3, %c0_4] : memref<1x128xf32, #tpu.memory_space<vmem>>, vector<1x128xf32>
    %4 = vector.broadcast %3 : vector<1x128xf32> to vector<8x128xf32>
    %5 = arith.addf %2, %4 : vector<8x128xf32>
    %cst_5 = arith.constant 0.000000e+00 : f32
    %6 = vector.broadcast %cst_5 : f32 to vector<8x128xf32>
    %7 = arith.maximumf %5, %6 : vector<8x128xf32>
    %c0_6 = arith.constant 0 : index
    %c0_7 = arith.constant 0 : index
    %8 = vector.load %arg4[%c0_6, %c0_7] : memref<128x128xf32, #tpu.memory_space<vmem>>, vector<128x128xf32>
    %cst_8 = arith.constant dense<0.000000e+00> : vector<8x128xf32>
    %9 = tpu.matmul %7, %8, %cst_8 {dimension_numbers = #tpu.dot_dimension_numbers<[1], [0], [0], [1], [0, 0, 1, 1], [], []>} : vector<8x128xf32>, vector<128x128xf32>, vector<8x128xf32> -> vector<8x128xf32>
    %c0_9 = arith.constant 0 : index
    %c0_10 = arith.constant 0 : index
    %10 = vector.load %arg5[%c0_9, %c0_10] : memref<1x128xf32, #tpu.memory_space<vmem>>, vector<1x128xf32>
    %11 = vector.broadcast %10 : vector<1x128xf32> to vector<8x128xf32>
    %12 = arith.addf %9, %11 : vector<8x128xf32>
    %cst_11 = arith.constant 0.000000e+00 : f32
    %13 = vector.broadcast %cst_11 : f32 to vector<8x128xf32>
    %14 = arith.maximumf %12, %13 : vector<8x128xf32>
    %c0_12 = arith.constant 0 : index
    %c0_13 = arith.constant 0 : index
    %15 = vector.load %arg6[%c0_12, %c0_13] : memref<8x128xf32, #tpu.memory_space<vmem>>, vector<8x128xf32>
    tpu.vector_store %arg6[%c0_12, %c0_13], %14 {strides = array<i32>} : memref<8x128xf32, #tpu.memory_space<vmem>>, vector<8x128xf32>,
    return
  }
  func.func @transform_0(%arg0: i32) -> (i32, i32) {
    %c0_i32 = arith.constant 0 : i32
    %c0_i32_0 = arith.constant 0 : i32
    return %arg0, %c0_i32 : i32, i32
  }
  func.func @transform_1(%arg0: i32) -> (i32, i32) {
    %c0_i32 = arith.constant 0 : i32
    %c0_i32_0 = arith.constant 0 : i32
    %c0_i32_1 = arith.constant 0 : i32
    return %c0_i32, %c0_i32_0 : i32, i32
  }
  func.func @transform_2(%arg0: i32) -> (i32, i32) {
    %c0_i32 = arith.constant 0 : i32
    %c0_i32_0 = arith.constant 0 : i32
    %c0_i32_1 = arith.constant 0 : i32
    return %c0_i32, %c0_i32_0 : i32, i32
  }
  func.func @transform_3(%arg0: i32) -> (i32, i32) {
    %c0_i32 = arith.constant 0 : i32
    %c0_i32_0 = arith.constant 0 : i32
    %c0_i32_1 = arith.constant 0 : i32
    return %c0_i32, %c0_i32_0 : i32, i32
  }
  func.func @transform_4(%arg0: i32) -> (i32, i32) {
    %c0_i32 = arith.constant 0 : i32
    %c0_i32_0 = arith.constant 0 : i32
    %c0_i32_1 = arith.constant 0 : i32
    return %c0_i32, %c0_i32_0 : i32, i32
  }
  func.func @transform_5(%arg0: i32) -> (i32, i32) {
    %c0_i32 = arith.constant 0 : i32
    %c0_i32_0 = arith.constant 0 : i32
    return %arg0, %c0_i32 : i32, i32
  }
}

</mosaic_0001>

<bundles_post_ra>
// kernel: tpu_custom_call.1
= control target key start
LH: loop header
LB: loop body
LE: loop exit
PB: predicated region body
PF: predicated region fallthrough
CT: control target
= control target key end

     0   :  { %10 = vsyncpa [#allocation3], 0  ;;  %s556_s0 = inlined_call_operand.hbm [shape: f32[8,128], index: 0, kind: input, shape index: {}]   ;;  %s557_s1 = inlined_call_operand.hbm [shape: f32[128,128], index: 1, kind: input, shape index: {}]   ;;  %s558_s2 = inlined_call_operand.vmem [shape: f32[1,128], index: 2, kind: input, shape index: {}]   ;;  %s559_s3 = inlined_call_operand.hbm [shape: f32[128,128], index: 3, kind: input, shape index: {}]   ;;  %s560_s4 = inlined_call_operand.vmem [shape: f32[1,128], index: 4, kind: input, shape index: {}]   ;;  %s561_s5 = inlined_call_operand.hbm [shape: f32[8,128], index: 5, kind: output, shape index: {}]  }
   0x1   :  { %11 = vsyncpa [#allocation6], 0 }
   0x2   :  { %12 = vsyncpa [#allocation4], 0  ;;  %s466_s18 = smov [#allocation5]  }
   0x3   :  { %s28_s19 = sshll.u32 %s466_s18, 4  ;;  %s29_s19 = int_to_ptr.vmem [resolvable:$true] %s28_s19 }
   0x4   :  { %s388_s20 = scalar_lea.vmem %s29_s19, 2048  ;;  %p393_p1 = scmp.lt.s32.totalorder %s29_s19, %s29_s19 }
   0x5   :  { %p389_p0 = scmp.ne.s32.totalorder %s29_s19, %s388_s20  ;;  %p394_p2 = scmp.lt.s32.totalorder %s388_s20, %s388_s20 }
   0x7   :  { %p395_p3 = por %p394_p2, %p393_p1 }
   0x9   :  { %p396_p4 = pnand %p395_p3, %p389_p0 }
   0xb   :  { %399 = shalt.err (!%p396_p4)
}
   0xc   :  { %s467_s21 = smov 128   ;;  %s468_s22 = smov 8  }
   0xd   :  { %34 = dma.hbm_to_vmem [thread:$0]  %s557_s1, 2048, %s29_s19, [#allocation6], %s467_s21, %s467_s21, %s468_s22  }
   0xe   :  { %s469_s25 = smov [#allocation2]   ;;  %s470_s27 = smov [#allocation7]  }
   0xf   :  { %s19_s26 = sshll.u32 %s469_s25, 4  ;;  %s42_s28 = sshll.u32 %s470_s27, 4  ;;  %s20_s26 = int_to_ptr.vmem [resolvable:$true] %s19_s26  ;;  %s43_s28 = int_to_ptr.vmem [resolvable:$true] %s42_s28 }
  0x10   :  { %s408_s29 = scalar_lea.vmem %s20_s26, 128  ;;  %p413_p6 = scmp.lt.s32.totalorder %s20_s26, %s20_s26 }
  0x11   :  { %p409_p5 = scmp.ne.s32.totalorder %s20_s26, %s408_s29  ;;  %p414_p7 = scmp.lt.s32.totalorder %s408_s29, %s408_s29 }
  0x13   :  { %p415_p8 = por %p414_p7, %p413_p6 }
  0x15   :  { %p416_p9 = pnand %p415_p8, %p409_p5 }
  0x17   :  { %419 = shalt.err (!%p416_p9)
}
  0x18   :  { %22 = dma.hbm_to_vmem [thread:$0]  %s556_s0, 128, %s20_s26, [#allocation3]  }
  0x19   :  { %s428_s7 = scalar_lea.vmem %s43_s28, 2048  ;;  %p433_p11 = scmp.lt.s32.totalorder %s43_s28, %s43_s28 }
  0x1a   :  { %p429_p10 = scmp.ne.s32.totalorder %s43_s28, %s428_s7  ;;  %p434_p12 = scmp.lt.s32.totalorder %s428_s7, %s428_s7 }
  0x1c   :  { %p435_p13 = por %p434_p12, %p433_p11 }
  0x1e   :  { %p436_p0 = pnand %p435_p13, %p429_p10 }
  0x20   :  { %439 = shalt.err (!%p436_p0)
}
  0x21   :  { %48 = dma.hbm_to_vmem [thread:$0]  %s559_s3, 2048, %s43_s28, [#allocation6], %s467_s21, %s467_s21, %s468_s22  }
  0x22   :  { %460 = dma.done.wait [#allocation3], 128  }
  0x23   :  { %461 = vsyncadd [#allocation3], 4294967168 }
  0x24   :  { %462 = dma.done.wait [#allocation6], 4096  }
  0x25   :  { %463 = vsyncadd [#allocation6], 4294963200  ;;  %v471_v0 = vmov 0.0   ;;  %vm472_vm0 = vmmov 0   ;;  %v76_v1 = vld [vmem:[#allocation5 + $0x78] sm:$0xff]  ;;  %v75_v2 = vld [vmem:[#allocation5 + $0x70] sm:$0xff] }
  0x26   :  { %302 = vmatprep.subr.mxu0 %v471_v0  ;;  %334 = vmatprep.mubr.msk.f32.mxu0 %vm472_vm0, %v471_v0  ;;  %v74_v3 = vld [vmem:[#allocation5 + $0x68] sm:$0xff]  ;;  %v73_v4 = vld [vmem:[#allocation5 + $0x60] sm:$0xff]  ;;  %v170_v5 = vld [vmem:[#allocation7 + $0x78] sm:$0xff]  ;;  %s473_s11 = smov [#allocation8]  }
  0x27   :  { %337 = vmatprep.subr.mxu1 %v471_v0  ;;  %369 = vmatprep.mubr.msk.f32.mxu1 %vm472_vm0, %v471_v0  ;;  %v72_v6 = vld [vmem:[#allocation5 + $0x58] sm:$0xff]  ;;  %v169_v7 = vld [vmem:[#allocation7 + $0x70] sm:$0xff]  ;;  %v168_v8 = vld [vmem:[#allocation7 + $0x68] sm:$0xff]  ;;  %s256_s12 = sshll.u32 %s473_s11, 4  ;;  %s257_s12 = int_to_ptr.vmem [resolvable:$true] %s256_s12 }
  0x28   :  { %303 = vmatpush3.msra.mxu0 %v76_v1  ;;  %338 = vmatpush3.msra.mxu1 %v170_v5  ;;  %v71_v9 = vld [vmem:[#allocation5 + $0x50] sm:$0xff]  ;;  %v167_v10 = vld [vmem:[#allocation7 + $0x60] sm:$0xff]  ;;  %v70_v11 = vld [vmem:[#allocation5 + $0x48] sm:$0xff]  ;;  %s440_s13 = scalar_lea.vmem %s257_s12, 128  ;;  %p445_p2 = scmp.lt.s32.totalorder %s257_s12, %s257_s12 }
  0x29   :  { %304 = vmatprep.subr.mxu0 %v471_v0  ;;  %339 = vmatprep.subr.mxu1 %v471_v0  ;;  %v166_v12 = vld [vmem:[#allocation7 + $0x58] sm:$0xff]  ;;  %v69_v13 = vld [vmem:[#allocation5 + $0x40] sm:$0xff]  ;;  %v165_v14 = vld [vmem:[#allocation7 + $0x50] sm:$0xff]  ;;  %p441_p1 = scmp.ne.s32.totalorder %s257_s12, %s440_s13  ;;  %p446_p3 = scmp.lt.s32.totalorder %s440_s13, %s440_s13 }
  0x2a   :  { %305 = vmatpush3.msra.mxu0 %v75_v2  ;;  %340 = vmatpush3.msra.mxu1 %v169_v7  ;;  %v68_v15 = vld [vmem:[#allocation5 + $0x38] sm:$0xff]  ;;  %v164_v16 = vld [vmem:[#allocation7 + $0x48] sm:$0xff]  ;;  %v67_v17 = vld [vmem:[#allocation5 + $0x30] sm:$0xff] }
  0x2b   :  { %306 = vmatprep.subr.mxu0 %v471_v0  ;;  %341 = vmatprep.subr.mxu1 %v471_v0  ;;  %v163_v18 = vld [vmem:[#allocation7 + $0x40] sm:$0xff]  ;;  %v66_v19 = vld [vmem:[#allocation5 + $0x28] sm:$0xff]  ;;  %v162_v20 = vld [vmem:[#allocation7 + $0x38] sm:$0xff]  ;;  %p447_p4 = por %p446_p3, %p445_p2 }
  0x2c   :  { %307 = vmatpush3.msra.mxu0 %v74_v3  ;;  %342 = vmatpush3.msra.mxu1 %v168_v8  ;;  %v65_v21 = vld [vmem:[#allocation5 + $0x20] sm:$0xff]  ;;  %v161_v22 = vld [vmem:[#allocation7 + $0x30] sm:$0xff]  ;;  %v64_v23 = vld [vmem:[#allocation5 + $0x18] sm:$0xff] }
  0x2d   :  { %308 = vmatprep.subr.mxu0 %v471_v0  ;;  %343 = vmatprep.subr.mxu1 %v471_v0  ;;  %v160_v24 = vld [vmem:[#allocation7 + $0x28] sm:$0xff]  ;;  %v63_v25 = vld [vmem:[#allocation5 + $0x10] sm:$0xff]  ;;  %v159_v26 = vld [vmem:[#allocation7 + $0x20] sm:$0xff]  ;;  %p448_p5 = pnand %p447_p4, %p441_p1 }
  0x2e   :  { %309 = vmatpush3.msra.mxu0 %v73_v4  ;;  %344 = vmatpush3.msra.mxu1 %v167_v10  ;;  %v62_v27 = vld [vmem:[#allocation5 + $0x8] sm:$0xff]  ;;  %v158_v28 = vld [vmem:[#allocation7 + $0x18] sm:$0xff]  ;;  %v61_v29 = vld [vmem:[#allocation5] sm:$0xff] }
  0x2f   :  { %310 = vmatprep.subr.mxu0 %v471_v0  ;;  %345 = vmatprep.subr.mxu1 %v471_v0  ;;  %v60_v30 = vld [vmem:[#allocation2] sm:$0xff]  ;;  %v157_v31 = vld [vmem:[#allocation7 + $0x10] sm:$0xff]  ;;  %v156_v32 = vld [vmem:[#allocation7 + $0x8] sm:$0xff] }
  0x30   :  { %311 = vmatpush3.msra.mxu0 %v72_v6  ;;  %346 = vmatpush3.msra.mxu1 %v166_v12  ;;  %v155_v33 = vld [vmem:[#allocation7] sm:$0xff]  ;;  %v266_v34 = vld [vmem:[%s558_s2] ss:$0 sm:$0xff] }
  0x31   :  { %312 = vmatprep.subr.mxu0 %v471_v0  ;;  %347 = vmatprep.subr.mxu1 %v471_v0  ;;  %v267_v39 = vld [vmem:[%s560_s4] ss:$0 sm:$0xff] }
  0x32   :  { %313 = vmatpush3.msra.mxu0 %v71_v9  ;;  %348 = vmatpush3.msra.mxu1 %v165_v14 }
  0x33   :  { %314 = vmatprep.subr.mxu0 %v471_v0  ;;  %349 = vmatprep.subr.mxu1 %v471_v0 }
  0x34   :  { %315 = vmatpush3.msra.mxu0 %v70_v11  ;;  %350 = vmatpush3.msra.mxu1 %v164_v16 }
  0x35   :  { %316 = vmatprep.subr.mxu0 %v471_v0  ;;  %351 = vmatprep.subr.mxu1 %v471_v0 }
  0x36   :  { %317 = vmatpush3.msra.mxu0 %v69_v13  ;;  %352 = vmatpush3.msra.mxu1 %v163_v18 }
  0x37   :  { %318 = vmatprep.subr.mxu0 %v471_v0  ;;  %353 = vmatprep.subr.mxu1 %v471_v0 }
  0x38   :  { %319 = vmatpush3.msra.mxu0 %v68_v15  ;;  %354 = vmatpush3.msra.mxu1 %v162_v20 }
  0x39   :  { %320 = vmatprep.subr.mxu0 %v471_v0  ;;  %355 = vmatprep.subr.mxu1 %v471_v0 }
  0x3a   :  { %321 = vmatpush3.msra.mxu0 %v67_v17  ;;  %356 = vmatpush3.msra.mxu1 %v161_v22 }
  0x3b   :  { %322 = vmatprep.subr.mxu0 %v471_v0  ;;  %357 = vmatprep.subr.mxu1 %v471_v0 }
  0x3c   :  { %323 = vmatpush3.msra.mxu0 %v66_v19  ;;  %358 = vmatpush3.msra.mxu1 %v160_v24 }
  0x3d   :  { %324 = vmatprep.subr.mxu0 %v471_v0  ;;  %359 = vmatprep.subr.mxu1 %v471_v0 }
  0x3e   :  { %325 = vmatpush3.msra.mxu0 %v65_v21  ;;  %360 = vmatpush3.msra.mxu1 %v159_v26 }
  0x3f   :  { %326 = vmatprep.subr.mxu0 %v471_v0  ;;  %361 = vmatprep.subr.mxu1 %v471_v0 }
  0x40   :  { %327 = vmatpush3.msra.mxu0 %v64_v23  ;;  %362 = vmatpush3.msra.mxu1 %v158_v28 }
  0x41   :  { %328 = vmatprep.subr.mxu0 %v471_v0  ;;  %363 = vmatprep.subr.mxu1 %v471_v0 }
  0x42   :  { %329 = vmatpush3.msra.mxu0 %v63_v25  ;;  %364 = vmatpush3.msra.mxu1 %v157_v31 }
  0x43   :  { %330 = vmatprep.subr.mxu0 %v471_v0  ;;  %365 = vmatprep.subr.mxu1 %v471_v0 }
  0x44   :  { %331 = vmatpush3.msra.mxu0 %v62_v27  ;;  %366 = vmatpush3.msra.mxu1 %v156_v32 }
  0x45   :  { %332 = vmatprep.subr.mxu0 %v471_v0  ;;  %367 = vmatprep.subr.mxu1 %v471_v0 }
  0x46   :  { %333 = vmatpush3.msra.mxu0 %v61_v29  ;;  %368 = vmatpush3.msra.mxu1 %v155_v33 }
  0x47   :  { %335 = vmatmul.mubr.f32.vlgmr.msra.gmra.mxu0 %v60_v30 }
 0x107   :  { %v150_v35 = vpop.f32.mrf.mxu0 }
 0x108   :  { %v151_v36 = vadd.f32 %v266_v34, %v150_v35 }
 0x109   :  { %v336_v37 = vpop.f32.mrf.mxu0 }
 0x10a   :  { %v154_v38 = vmax.f32 %v151_v36, 0.0 }
 0x10c   :  { %370 = vmatmul.mubr.f32.vlgmr.msra.gmra.mxu1 %v154_v38 }
 0x1cc   :  { %v244_v40 = vpop.f32.mrf.mxu1 }
 0x1cd   :  { %v245_v41 = vadd.f32 %v267_v39, %v244_v40 }
 0x1ce   :  { %v371_v42 = vpop.f32.mrf.mxu1 }
 0x1cf   :  { %v248_v43 = vmax.f32 %v245_v41, 0.0 }
 0x1d1   :  { %249 = vst [vmem:[#allocation8] sm:$0xff] %v248_v43 }
 0x1d2   :  { %451 = shalt.err (!%p448_p5)
}
 0x1d3   :  { %259 = dma.vmem_to_hbm [thread:$0]  %s257_s12, 128, %s561_s5, [#allocation4]  }
 0x1d4   :  { %464 = dma.done.wait [#allocation4], 128  }
 0x1d5   :  { %465 = vsyncadd [#allocation4], 4294967168 }
 0x1d6   :  { %263 = vsyncpa [#allocation3], 1 }
 0x1d7   :  { %264 = vsyncpa [#allocation6], 1 }
 0x1d8   :  { %265 = vsyncpa [#allocation4], 1 }

</bundles_post_ra>
